<compile_context>
chip_gen: v6e
topology: v6e:2x2x1
jax: 0.10.0
libtpu: 0.0.40
codegen_flags: <defaults>
</compile_context>

<pallas_src>
import math

import jax
import jax.numpy as jnp
from jax.experimental import pallas as pl
from jax.experimental.pallas import tpu as pltpu


def _round_up(x, m):
    return ((x + m - 1) // m) * m


# ----------------------------- Pallas kernel -------------------------------
def vcdn_kernel(x_ref, e0_ref, e1_ref, e2_ref,
                w1_ref, b1_ref, w2_ref, b2_ref,
                out_ref):
    """One batch tile.  x_ref: (tb, 3C) = the three views concatenated."""
    s = jax.nn.sigmoid(x_ref[...])                                   # EUP, (tb, 3C)

    # Digit "expansion" on the MXU via constant one-hot matrices:
    #   e_v[b, k] = sigmoid(x_v)[b, digit_v(k)]   (exact: one nonzero term/col,
    #   0 in padded lanes k >= C**3)
    e0 = jnp.dot(s, e0_ref[...], preferred_element_type=jnp.float32)
    e1 = jnp.dot(s, e1_ref[...], preferred_element_type=jnp.float32)
    e2 = jnp.dot(s, e2_ref[...], preferred_element_type=jnp.float32)
    feat = e0 * e1 * e2                                              # (tb, in_dim_pad)

    # MLP: Linear -> LeakyReLU(0.25) -> Linear  (both matmuls on the MXU).
    h = jnp.dot(feat, w1_ref[...], preferred_element_type=jnp.float32) + b1_ref[...]
    h = jnp.maximum(h, 0.25 * h)                                     # LeakyReLU(0.25)
    out = jnp.dot(h, w2_ref[...], preferred_element_type=jnp.float32) + b2_ref[...]
    out_ref[...] = out.astype(out_ref.dtype)


# ----------------------------- Helpers ---------------------------------------
def _digit_onehot_mats(num_cls, num_view, in_dim_pad):
    """E_v[v*C + c, k] = 1 iff digit_v(k) == c and k < C**num_view (else 0)."""
    C = num_cls
    k = jnp.arange(in_dim_pad, dtype=jnp.int32)
    valid = (k < C ** num_view)[None, :]
    rows = jnp.arange(num_view * C, dtype=jnp.int32)[:, None]        # (3C, 1)
    mats = []
    for v in range(num_view):
        digit = (k // (C ** (num_view - 1 - v))) % C                 # (in_dim_pad,)
        mats.append(((rows == (v * C + digit)[None, :]) & valid)
                    .astype(jnp.float32))
    return mats


def _choose_batch_tiling(B, tile_b):
    """Pick (tb, Bp, n_tiles): <8 rows padding waste/tile, >=2 even grid steps
    when B >= 16 so both v7x TensorCores get work ("parallel" batch axis)."""
    n_tiles = max(1, pl.cdiv(B, tile_b))
    if B >= 16:
        n_tiles = max(n_tiles, 2)
        n_tiles += n_tiles % 2
    tb = _round_up(pl.cdiv(B, n_tiles), 8)
    return tb, tb * n_tiles, n_tiles


# ----------------------------- Wrapper ---------------------------------------
def vcdn_forward(in_list, padded_params, num_cls, *, tile_b=2048):
    """Pallas VCDN forward.  in_list: list of 3 arrays (B, num_cls)."""
    assert len(in_list) == 3, "kernel is specialized to num_view == 3"
    w1p, b1p, w2p, b2p = padded_params
    B, C = in_list[0].shape
    assert C == num_cls
    in_dim_pad, h_pad = w1p.shape
    c_out = w2p.shape[1]                                             # = num_cls (unpadded)

    tb, Bp, n_tiles = _choose_batch_tiling(B, tile_b)

    # One concatenated input stream (single DMA per step, 3x less VMEM padding).
    x_all = jnp.concatenate(in_list, axis=1).astype(jnp.float32)     # (B, 3C)
    if Bp != B:
        x_all = jnp.pad(x_all, ((0, Bp - B), (0, 0)))

    e0, e1, e2 = _digit_onehot_mats(num_cls, 3, in_dim_pad)

    const = lambda i: (0, 0)        # weights / constants: VMEM-resident across steps
    in_specs = [
        pl.BlockSpec((tb, 3 * C), lambda i: (i, 0)),
        pl.BlockSpec(e0.shape, const),
        pl.BlockSpec(e1.shape, const),
        pl.BlockSpec(e2.shape, const),
        pl.BlockSpec(w1p.shape, const),
        pl.BlockSpec(b1p.shape, const),
        pl.BlockSpec(w2p.shape, const),
        pl.BlockSpec(b2p.shape, const),
    ]
    out_spec = pl.BlockSpec((tb, c_out), lambda i: (i, 0))           # un-padded writeback

    cost = pl.CostEstimate(
        flops=2 * Bp * (3 * (3 * C) * in_dim_pad + in_dim_pad * h_pad
                        + h_pad * c_out) + 4 * Bp * (in_dim_pad + h_pad),
        transcendentals=3 * Bp * C,
        bytes_accessed=4 * (Bp * 3 * C + 3 * (3 * C) * in_dim_pad
                            + in_dim_pad * h_pad + h_pad
                            + h_pad * c_out + c_out + Bp * c_out),
    )

    out = pl.pallas_call(
        vcdn_kernel,
        out_shape=jax.ShapeDtypeStruct((Bp, c_out), jnp.float32),
        grid=(n_tiles,),
        in_specs=in_specs,
        out_specs=out_spec,
        compiler_params=pltpu.CompilerParams(
            dimension_semantics=("parallel",),         # shard batch tiles on v7x
            vmem_limit_bytes=32 * 1024 * 1024),        # safe on v5e / v6e / v7x
        cost_estimate=cost,
    )(x_all, e0, e1, e2, w1p, b1p, w2p, b2p)

    return out[:B]


# ----------------------------- Parameter setup ------------------------------
def init_vcdn_params(key, num_view, num_cls, hvcdn_dim):
    """Logical (unpadded) params: xavier_normal_ weights, zero biases."""
    in_dim = num_cls ** num_view
    k1, k2 = jax.random.split(key)
    std1 = math.sqrt(2.0 / (in_dim + hvcdn_dim))
    std2 = math.sqrt(2.0 / (hvcdn_dim + num_cls))
    w1 = jax.random.normal(k1, (in_dim, hvcdn_dim), jnp.float32) * std1   # (in, out)
    b1 = jnp.zeros((hvcdn_dim,), jnp.float32)
    w2 = jax.random.normal(k2, (hvcdn_dim, num_cls), jnp.float32) * std2
    b2 = jnp.zeros((num_cls,), jnp.float32)
    return w1, b1, w2, b2


def pad_vcdn_params(params):
    """Zero-pad in_dim and hidden to 128-lane multiples (exact / inert).
    The output dim stays at num_cls (un-padded writeback)."""
    w1, b1, w2, b2 = params
    in_dim, h = w1.shape
    c_out = w2.shape[1]
    in_pad = _round_up(in_dim, 128)
    h_pad = _round_up(h, 128)
    w1p = jnp.zeros((in_pad, h_pad), jnp.float32).at[:in_dim, :h].set(w1)
    b1p = jnp.zeros((1, h_pad), jnp.float32).at[0, :h].set(b1)
    w2p = jnp.zeros((h_pad, c_out), jnp.float32).at[:h, :].set(w2)
    b2p = b2.reshape(1, c_out).astype(jnp.float32)
    return w1p, b1p, w2p, b2p


# ----------------------------- Pure-JAX reference ---------------------------
def vcdn_reference(in_list, params, num_cls):
    w1, b1, w2, b2 = params
    num_view = len(in_list)
    s = [jax.nn.sigmoid(x) for x in in_list]
    x = jnp.matmul(s[0][:, :, None], s[1][:, None, :]).reshape(-1, num_cls ** 2, 1)
    for i in range(2, num_view):
        x = jnp.matmul(x, s[i][:, None, :]).reshape(-1, num_cls ** (i + 1), 1)
    feat = x.reshape(-1, num_cls ** num_view)
    h = feat @ w1 + b1
    h = jnp.where(h > 0, h, 0.25 * h)
    return h @ w2 + b2


# ----------------------------- Main -----------------------------------------
if __name__ == "__main__":
    num_view, num_cls, hvcdn_dim = 3, 4, 32
    batch = 64                      # small test; tiling forces 2 pipelined grid steps

    key = jax.random.PRNGKey(0)
    kp, kx0, kx1, kx2 = jax.random.split(key, 4)

    params = init_vcdn_params(kp, num_view, num_cls, hvcdn_dim)
    padded_params = pad_vcdn_params(params)
    in_list = [
        jax.random.normal(kx0, (batch, num_cls), jnp.float32),
        jax.random.normal(kx1, (batch, num_cls), jnp.float32),
        jax.random.normal(kx2, (batch, num_cls), jnp.float32),
    ]

    out = vcdn_forward(in_list, padded_params, num_cls)     # default tile_b
    out = jax.block_until_ready(out)

    ref = vcdn_reference(in_list, params, num_cls)
    assert out.shape == (batch, num_cls)
    assert jnp.allclose(out, ref, atol=1e-4, rtol=1e-4), "mismatch vs reference"

    print("KERNEL_OK")
</pallas_src>

<mosaic_0001>
module attributes {stable_mosaic.version = 11 : i64} {
  func.func @vcdn_kernel(%arg0: i32, %arg1: memref<32x12xf32, #tpu.memory_space<vmem>>, %arg2: memref<12x128xf32, #tpu.memory_space<vmem>>, %arg3: memref<12x128xf32, #tpu.memory_space<vmem>>, %arg4: memref<12x128xf32, #tpu.memory_space<vmem>>, %arg5: memref<128x128xf32, #tpu.memory_space<vmem>>, %arg6: memref<1x128xf32, #tpu.memory_space<vmem>>, %arg7: memref<128x4xf32, #tpu.memory_space<vmem>>, %arg8: memref<1x4xf32, #tpu.memory_space<vmem>>, %arg9: memref<32x4xf32, #tpu.memory_space<vmem>>) attributes {dimension_semantics = [#tpu.dimension_semantics<parallel>], iteration_bounds = array<i64: 2>, scalar_prefetch = 0 : i64, scratch_operands = 0 : i64, tpu.core_type = #tpu.core_type<tc>, window_params = [{transform_indices = @transform_0, window_bounds = array<i64: 32, 12>}, {pipeline_mode = #tpu.pipeline_mode<synchronous>, transform_indices = @transform_1, window_bounds = array<i64: 12, 128>}, {pipeline_mode = #tpu.pipeline_mode<synchronous>, transform_indices = @transform_2, window_bounds = array<i64: 12, 128>}, {pipeline_mode = #tpu.pipeline_mode<synchronous>, transform_indices = @transform_3, window_bounds = array<i64: 12, 128>}, {pipeline_mode = #tpu.pipeline_mode<synchronous>, transform_indices = @transform_4, window_bounds = array<i64: 128, 128>}, {pipeline_mode = #tpu.pipeline_mode<synchronous>, transform_indices = @transform_5, window_bounds = array<i64: 1, 128>}, {pipeline_mode = #tpu.pipeline_mode<synchronous>, transform_indices = @transform_6, window_bounds = array<i64: 128, 4>}, {pipeline_mode = #tpu.pipeline_mode<synchronous>, transform_indices = @transform_7, window_bounds = array<i64: 1, 4>}, {transform_indices = @transform_8, window_bounds = array<i64: 32, 4>}]} {
    %c0 = arith.constant 0 : index
    %c0_0 = arith.constant 0 : index
    %0 = vector.load %arg1[%c0, %c0_0] : memref<32x12xf32, #tpu.memory_space<vmem>>, vector<32x12xf32>
    %1 = arith.negf %0 : vector<32x12xf32>
    %2 = math.exp %1 : vector<32x12xf32>
    %cst = arith.constant 1.000000e+00 : f32
    %3 = vector.broadcast %cst : f32 to vector<32x12xf32>
    %4 = arith.addf %3, %2 : vector<32x12xf32>
    %5 = arith.divf %3, %4 : vector<32x12xf32>
    %c0_1 = arith.constant 0 : index
    %c0_2 = arith.constant 0 : index
    %6 = vector.load %arg2[%c0_1, %c0_2] : memref<12x128xf32, #tpu.memory_space<vmem>>, vector<12x128xf32>
    %cst_3 = arith.constant dense<0.000000e+00> : vector<32x128xf32>
    %7 = tpu.matmul %5, %6, %cst_3 {dimension_numbers = #tpu.dot_dimension_numbers<[1], [0], [0], [1], [0, 0, 1, 1], [], []>} : vector<32x12xf32>, vector<12x128xf32>, vector<32x128xf32> -> vector<32x128xf32>
    %c0_4 = arith.constant 0 : index
    %c0_5 = arith.constant 0 : index
    %8 = vector.load %arg3[%c0_4, %c0_5] : memref<12x128xf32, #tpu.memory_space<vmem>>, vector<12x128xf32>
    %cst_6 = arith.constant dense<0.000000e+00> : vector<32x128xf32>
    %9 = tpu.matmul %5, %8, %cst_6 {dimension_numbers = #tpu.dot_dimension_numbers<[1], [0], [0], [1], [0, 0, 1, 1], [], []>} : vector<32x12xf32>, vector<12x128xf32>, vector<32x128xf32> -> vector<32x128xf32>
    %c0_7 = arith.constant 0 : index
    %c0_8 = arith.constant 0 : index
    %10 = vector.load %arg4[%c0_7, %c0_8] : memref<12x128xf32, #tpu.memory_space<vmem>>, vector<12x128xf32>
    %cst_9 = arith.constant dense<0.000000e+00> : vector<32x128xf32>
    %11 = tpu.matmul %5, %10, %cst_9 {dimension_numbers = #tpu.dot_dimension_numbers<[1], [0], [0], [1], [0, 0, 1, 1], [], []>} : vector<32x12xf32>, vector<12x128xf32>, vector<32x128xf32> -> vector<32x128xf32>
    %12 = arith.mulf %7, %9 : vector<32x128xf32>
    %13 = arith.mulf %12, %11 : vector<32x128xf32>
    %c0_10 = arith.constant 0 : index
    %c0_11 = arith.constant 0 : index
    %14 = vector.load %arg5[%c0_10, %c0_11] : memref<128x128xf32, #tpu.memory_space<vmem>>, vector<128x128xf32>
    %cst_12 = arith.constant dense<0.000000e+00> : vector<32x128xf32>
    %15 = tpu.matmul %13, %14, %cst_12 {dimension_numbers = #tpu.dot_dimension_numbers<[1], [0], [0], [1], [0, 0, 1, 1], [], []>} : vector<32x128xf32>, vector<128x128xf32>, vector<32x128xf32> -> vector<32x128xf32>
    %c0_13 = arith.constant 0 : index
    %c0_14 = arith.constant 0 : index
    %16 = vector.load %arg6[%c0_13, %c0_14] : memref<1x128xf32, #tpu.memory_space<vmem>>, vector<1x128xf32>
    %17 = vector.broadcast %16 : vector<1x128xf32> to vector<32x128xf32>
    %18 = arith.addf %15, %17 : vector<32x128xf32>
    %cst_15 = arith.constant 2.500000e-01 : f32
    %19 = vector.broadcast %cst_15 : f32 to vector<32x128xf32>
    %20 = arith.mulf %19, %18 : vector<32x128xf32>
    %21 = arith.maximumf %18, %20 : vector<32x128xf32>
    %c0_16 = arith.constant 0 : index
    %c0_17 = arith.constant 0 : index
    %22 = vector.load %arg7[%c0_16, %c0_17] : memref<128x4xf32, #tpu.memory_space<vmem>>, vector<128x4xf32>
    %cst_18 = arith.constant dense<0.000000e+00> : vector<32x4xf32>
    %23 = tpu.matmul %21, %22, %cst_18 {dimension_numbers = #tpu.dot_dimension_numbers<[1], [0], [0], [1], [0, 0, 1, 1], [], []>} : vector<32x128xf32>, vector<128x4xf32>, vector<32x4xf32> -> vector<32x4xf32>
    %c0_19 = arith.constant 0 : index
    %c0_20 = arith.constant 0 : index
    %24 = vector.load %arg8[%c0_19, %c0_20] : memref<1x4xf32, #tpu.memory_space<vmem>>, vector<1x4xf32>
    %25 = vector.broadcast %24 : vector<1x4xf32> to vector<32x4xf32>
    %26 = arith.addf %23, %25 : vector<32x4xf32>
    %c0_21 = arith.constant 0 : index
    %c0_22 = arith.constant 0 : index
    %27 = vector.load %arg9[%c0_21, %c0_22] : memref<32x4xf32, #tpu.memory_space<vmem>>, vector<32x4xf32>
    tpu.vector_store %arg9[%c0_21, %c0_22], %26 {strides = array<i32>} : memref<32x4xf32, #tpu.memory_space<vmem>>, vector<32x4xf32>,
    return
  }
  func.func @transform_0(%arg0: i32) -> (i32, i32) {
    %c0_i32 = arith.constant 0 : i32
    %c0_i32_0 = arith.constant 0 : i32
    return %arg0, %c0_i32 : i32, i32
  }
  func.func @transform_1(%arg0: i32) -> (i32, i32) {
    %c0_i32 = arith.constant 0 : i32
    %c0_i32_0 = arith.constant 0 : i32
    %c0_i32_1 = arith.constant 0 : i32
    return %c0_i32, %c0_i32_0 : i32, i32
  }
  func.func @transform_2(%arg0: i32) -> (i32, i32) {
    %c0_i32 = arith.constant 0 : i32
    %c0_i32_0 = arith.constant 0 : i32
    %c0_i32_1 = arith.constant 0 : i32
    return %c0_i32, %c0_i32_0 : i32, i32
  }
  func.func @transform_3(%arg0: i32) -> (i32, i32) {
    %c0_i32 = arith.constant 0 : i32
    %c0_i32_0 = arith.constant 0 : i32
    %c0_i32_1 = arith.constant 0 : i32
    return %c0_i32, %c0_i32_0 : i32, i32
  }
  func.func @transform_4(%arg0: i32) -> (i32, i32) {
    %c0_i32 = arith.constant 0 : i32
    %c0_i32_0 = arith.constant 0 : i32
    %c0_i32_1 = arith.constant 0 : i32
    return %c0_i32, %c0_i32_0 : i32, i32
  }
  func.func @transform_5(%arg0: i32) -> (i32, i32) {
    %c0_i32 = arith.constant 0 : i32
    %c0_i32_0 = arith.constant 0 : i32
    %c0_i32_1 = arith.constant 0 : i32
    return %c0_i32, %c0_i32_0 : i32, i32
  }
  func.func @transform_6(%arg0: i32) -> (i32, i32) {
    %c0_i32 = arith.constant 0 : i32
    %c0_i32_0 = arith.constant 0 : i32
    %c0_i32_1 = arith.constant 0 : i32
    return %c0_i32, %c0_i32_0 : i32, i32
  }
  func.func @transform_7(%arg0: i32) -> (i32, i32) {
    %c0_i32 = arith.constant 0 : i32
    %c0_i32_0 = arith.constant 0 : i32
    %c0_i32_1 = arith.constant 0 : i32
    return %c0_i32, %c0_i32_0 : i32, i32
  }
  func.func @transform_8(%arg0: i32) -> (i32, i32) {
    %c0_i32 = arith.constant 0 : i32
    %c0_i32_0 = arith.constant 0 : i32
    return %arg0, %c0_i32 : i32, i32
  }
}

</mosaic_0001>

<bundles_post_ra>
// kernel: tpu_custom_call.1
= control target key start
LH: loop header
LB: loop body
LE: loop exit
PB: predicated region body
PF: predicated region fallthrough
CT: control target
= control target key end

     0   :  { %s1191_s27 = smov 0   ;;  %s1355_s0 = inlined_call_operand.vmem [shape: f32[64,12], index: 0, kind: input, shape index: {}]   ;;  %s1356_s1 = inlined_call_operand.vmem [shape: f32[12,128], index: 1, kind: input, shape index: {}]   ;;  %s1357_s2 = inlined_call_operand.vmem [shape: f32[12,128], index: 2, kind: input, shape index: {}]   ;;  %s1358_s3 = inlined_call_operand.vmem [shape: f32[12,128], index: 3, kind: input, shape index: {}]   ;;  %s1359_s4 = inlined_call_operand.vmem [shape: f32[128,128], index: 4, kind: input, shape index: {}]   ;;  %s1360_s5 = inlined_call_operand.vmem [shape: f32[1,128], index: 5, kind: input, shape index: {}]   ;;  %s1361_s6 = inlined_call_operand.vmem [shape: f32[128,4], index: 6, kind: input, shape index: {}]   ;;  %s1362_s7 = inlined_call_operand.vmem [shape: f32[1,4], index: 7, kind: input, shape index: {}]   ;;  %s1363_s8 = inlined_call_operand.vmem [shape: f32[64,4], index: 8, kind: output, shape index: {}]  }
   0x1 LB: > { %s914_s28 = sadd.s32 4294967295, %s1144_s27   ;;  %p918_p0 = scmp.ge.s32.totalorder %s1144_s27, 1  ;;  %s1144_s27 = sphi %s1191_s27, %s18_s27  }
   0x2   : > { %p263_p1 = scmp.lt.s32.totalorder %s1144_s27, 3 }
   0x4   : > { %p264_p2 = pnand %p918_p0, %p263_p1 }
   0x5   : > { %s919_s11 = sshll.u32 (!%p264_p2), %s914_s28, 2 }
   0x6   : > { %267 = sbr.rel (%p264_p2) target bundleno = 659 (0x293), region = 52  ;;  %p298_p3 = scmp.lt.s32.totalorder (!%p264_p2), %s919_s11, 7 }
   0xb   : > { %v338_v0 = vld [vmem:[%s1356_s1 + $0x8] sm:$0xf]  ;;  %vm352_vm0 = vcmask 1043456   ;;  %v337_v1 = vld [vmem:[%s1356_s1] sm:$0xff]  ;;  %s1365_s11 = smov (!%p298_p3, %s919_s11), 7  ;;  %vm339_vm1 = vcmask 97280  }
   0xc   : > { %1110 = vmatprep.subr.msk.mxu1 %vm352_vm0, %v338_v0  ;;  %1004 = vmatprep.subr.msk.mxu0 %vm352_vm0, %v338_v0  ;;  %v442_v2 = vld [vmem:[%s1357_s2 + $0x8] sm:$0xf]  ;;  %s920_s16 = sshll.u32 %s1365_s11, 3  ;;  %v531_v22 = vld [vmem:[%s1358_s3] sm:$0xff]  ;;  %v644_v26 = vld [vmem:[%s1359_s4 + $0x78] sm:$0xff]  ;;  %vm853_vm2 = vcmask 31744  }
   0xd   : > { %1112 = vmatpush3.msk.msra.mxu1 %vm352_vm0, %v338_v0  ;;  %1005 = vmatpush3.msk.msra.mxu0 %vm352_vm0, %v338_v0  ;;  %v532_v3 = vld [vmem:[%s1358_s3 + $0x8] sm:$0xf]  ;;  %s301_s19 = scalar_lea.vmem %s1355_s0, %s920_s16  ;;  %v441_v25 = vld [vmem:[%s1357_s2] sm:$0xff]  ;;  %v643_v27 = vld [vmem:[%s1359_s4 + $0x70] sm:$0xff]  ;;  %s307_s18 = scalar_lea.vmem %s1363_s8, %s920_s16 }
   0xe   : > { %1111 = vmatprep.subr.mxu1 %v337_v1  ;;  %1006 = vmatprep.subr.mxu0 %v337_v1  ;;  %v309_v4 = vld [vmem:[%s301_s19] sm:$0xff]  ;;  %v310_v5 = vld [vmem:[%s301_s19 + $0x8] sm:$0xff]  ;;  %v312_v6 = vld [vmem:[%s301_s19 + $0x18] sm:$0xff] }
   0xf   : > { %1113 = vmatpush3.msra.mxu1 %v337_v1  ;;  %1007 = vmatpush3.msra.mxu0 %v337_v1  ;;  %v923_v7 = vmul.f32 -1.442695, %v309_v4  ;;  %v924_v8 = vmul.f32 -1.442695, %v310_v5  ;;  %v926_v9 = vmul.f32 -1.442695, %v312_v6 }
  0x10   : > { %1014 = vmatprep.subr.msk.mxu1 %vm352_vm0, %v442_v2  ;;  %1024 = vmatprep.subr.msk.mxu0 %vm352_vm0, %v532_v3  ;;  %v311_v10 = vld [vmem:[%s301_s19 + $0x10] sm:$0xff]  ;;  %v642_v28 = vld [vmem:[%s1359_s4 + $0x68] sm:$0xff]  ;;  %v641_v29 = vld [vmem:[%s1359_s4 + $0x60] sm:$0xff] }
  0x11   : > { %1122 = vpow2.f32 %v923_v7  ;;  %v925_v11 = vmul.f32 -1.442695, %v311_v10  ;;  %v640_v30 = vld [vmem:[%s1359_s4 + $0x58] sm:$0xff]  ;;  %v639_v31 = vld [vmem:[%s1359_s4 + $0x50] sm:$0xff]  ;;  %v638_v32 = vld [vmem:[%s1359_s4 + $0x48] sm:$0xff] }
  0x12   : > { %1124 = vpow2.f32 %v924_v8  ;;  %v637_v33 = vld [vmem:[%s1359_s4 + $0x40] sm:$0xff]  ;;  %v636_v34 = vld [vmem:[%s1359_s4 + $0x38] sm:$0xff]  ;;  %v635_v35 = vld [vmem:[%s1359_s4 + $0x30] sm:$0xff] }
  0x13   : > { %1126 = vpow2.f32 %v926_v9  ;;  %v634_v36 = vld [vmem:[%s1359_s4 + $0x28] sm:$0xff]  ;;  %v633_v37 = vld [vmem:[%s1359_s4 + $0x20] sm:$0xff]  ;;  %v632_v38 = vld [vmem:[%s1359_s4 + $0x18] sm:$0xff] }
  0x14   : > { %1128 = vpow2.f32 %v925_v11  ;;  %v631_v39 = vld [vmem:[%s1359_s4 + $0x10] sm:$0xff]  ;;  %v630_v40 = vld [vmem:[%s1359_s4 + $0x8] sm:$0xff]  ;;  %v629_v41 = vld [vmem:[%s1359_s4] sm:$0xff] }
  0x15   : > { %v760_v42 = vld [vmem:[%s1361_s6 + $0x78] sm:$0xff]  ;;  %v759_v43 = vld [vmem:[%s1361_s6 + $0x70] sm:$0xff]  ;;  %v758_v44 = vld [vmem:[%s1361_s6 + $0x68] sm:$0xff] }
  0x16   : > { %v757_v45 = vld [vmem:[%s1361_s6 + $0x60] sm:$0xff]  ;;  %v756_v46 = vld [vmem:[%s1361_s6 + $0x58] sm:$0xff]  ;;  %v755_v47 = vld [vmem:[%s1361_s6 + $0x50] sm:$0xff] }
  0x17   : > { %v754_v48 = vld [vmem:[%s1361_s6 + $0x48] sm:$0xff]  ;;  %v753_v49 = vld [vmem:[%s1361_s6 + $0x40] sm:$0xff]  ;;  %v752_v50 = vld [vmem:[%s1361_s6 + $0x38] sm:$0xff] }
  0x18   : > { %v751_v51 = vld [vmem:[%s1361_s6 + $0x30] sm:$0xff]  ;;  %v750_v52 = vld [vmem:[%s1361_s6 + $0x28] sm:$0xff]  ;;  %v749_v9 = vld [vmem:[%s1361_s6 + $0x20] sm:$0xff] }
  0x19   : > { %v748_v10 = vld [vmem:[%s1361_s6 + $0x18] sm:$0xff]  ;;  %v747_v11 = vld [vmem:[%s1361_s6 + $0x10] sm:$0xff] }
  0x1e   : > { %v1123_v12 = vpop.eup %1122 }
  0x1f   : > { %v1125_v13 = vpop.eup %1124  ;;  %v325_v14 = vadd.f32 1.0, %v1123_v12  ;;  %v746_v12 = vld [vmem:[%s1361_s6 + $0x8] sm:$0xff] }
  0x20   : > { %v1127_v15 = vpop.eup %1126  ;;  %v326_v16 = vadd.f32 1.0, %v1125_v13  ;;  %v745_v13 = vld [vmem:[%s1361_s6] sm:$0xff] }
  0x21   : > { %v1129_v17 = vpop.eup %1128  ;;  %v328_v18 = vadd.f32 1.0, %v1127_v15  ;;  %1130 = vrcp.f32 %v325_v14  ;;  %v942_v14 = vld [vmem:[%s1360_s5] ss:$0 sm:$0xff] }
  0x22   : > { %1132 = vrcp.f32 %v326_v16  ;;  %v327_v19 = vadd.f32 1.0, %v1129_v17 }
  0x23   : > { %1134 = vrcp.f32 %v328_v18 }
  0x24   : > { %1136 = vrcp.f32 %v327_v19 }
  0x2e   : > { %v1131_v20 = vpop.eup %1130 }
  0x2f   : > { %v1133_v21 = vpop.eup %1132  ;;  %1008 = vmatprep.mubr.msk.f32.mxu0 %vm339_vm1, %v1131_v20 }
  0x30   : > { %v1135_v23 = vpop.eup %1134  ;;  %1009 = vmatmul.mubr.msk.f32.vlgmr.msra.gmra.mxu0 %vm339_vm1, %v1133_v21 }
  0x31   : > { %v1137_v24 = vpop.eup %1136  ;;  %1025 = vmatpush3.msk.msra.mxu0 %vm352_vm0, %v532_v3  ;;  %1028 = vmatprep.mubr.msk.f32.mxu0 %vm339_vm1, %v1131_v20 }
  0x32   : > { %1011 = vmatprep.mubr.msk.f32.mxu1 %vm339_vm1, %v1137_v24  ;;  %1026 = vmatprep.subr.mxu0 %v531_v22 }
  0x33   : > { %1012 = vmatmul.mubr.msk.f32.vlgmr.msra.gmra.mxu1 %vm339_vm1, %v1135_v23  ;;  %1027 = vmatpush3.msra.mxu0 %v531_v22 }
  0x34   : > { %1015 = vmatpush3.msk.msra.mxu1 %vm352_vm0, %v442_v2  ;;  %1018 = vmatprep.mubr.msk.f32.mxu1 %vm339_vm1, %v1131_v20 }
  0x35   : > { %1016 = vmatprep.subr.mxu1 %v441_v25  ;;  %1029 = vmatmul.mubr.msk.f32.vlgmr.msra.gmra.mxu0 %vm339_vm1, %v1133_v21 }
  0x36   : > { %1017 = vmatpush3.msra.mxu1 %v441_v25  ;;  %1031 = vmatprep.mubr.msk.f32.mxu0 %vm339_vm1, %v1137_v24 }
  0x37   : > { %1019 = vmatmul.mubr.msk.f32.vlgmr.msra.gmra.mxu1 %vm339_vm1, %v1133_v21  ;;  %1034 = vmatprep.subr.mxu1 %v644_v26 }
  0x38   : > { %1021 = vmatprep.mubr.msk.f32.mxu1 %vm339_vm1, %v1137_v24  ;;  %1035 = vmatpush3.msra.mxu1 %v644_v26 }
  0x39   : > { %1032 = vmatmul.mubr.msk.f32.gmra.mxu0 %vm339_vm1, %v1135_v23  ;;  %1036 = vmatprep.subr.mxu1 %v643_v27 }
  0x3a   : > { %1037 = vmatpush3.msra.mxu1 %v643_v27  ;;  %1072 = vmatprep.subr.mxu0 %v760_v42 }
  0x3b   : > { %1022 = vmatmul.mubr.msk.f32.gmra.mxu1 %vm339_vm1, %v1135_v23  ;;  %1038 = vmatprep.subr.mxu1 %v642_v28 }
  0x3c   : > { %1039 = vmatpush3.msra.mxu1 %v642_v28  ;;  %1073 = vmatpush3.msra.mxu0 %v760_v42 }
  0x3d   : > { %1040 = vmatprep.subr.mxu1 %v641_v29  ;;  %1074 = vmatprep.subr.mxu0 %v759_v43 }
  0x3e   : > { %1041 = vmatpush3.msra.mxu1 %v641_v29  ;;  %1075 = vmatpush3.msra.mxu0 %v759_v43 }
  0x3f   : > { %1042 = vmatprep.subr.mxu1 %v640_v30  ;;  %1076 = vmatprep.subr.mxu0 %v758_v44 }
  0x40   : > { %1043 = vmatpush3.msra.mxu1 %v640_v30  ;;  %1077 = vmatpush3.msra.mxu0 %v758_v44 }
  0x41   : > { %1044 = vmatprep.subr.mxu1 %v639_v31  ;;  %1078 = vmatprep.subr.mxu0 %v757_v45 }
  0x42   : > { %1045 = vmatpush3.msra.mxu1 %v639_v31  ;;  %1079 = vmatpush3.msra.mxu0 %v757_v45 }
  0x43   : > { %1046 = vmatprep.subr.mxu1 %v638_v32  ;;  %1080 = vmatprep.subr.mxu0 %v756_v46 }
  0x44   : > { %1047 = vmatpush3.msra.mxu1 %v638_v32  ;;  %1081 = vmatpush3.msra.mxu0 %v756_v46  ;;  %v943_v32 = vld [vmem:[%s1362_s7] ss:$0 sm:$0xff] }
  0x45   : > { %1048 = vmatprep.subr.mxu1 %v637_v33  ;;  %1082 = vmatprep.subr.mxu0 %v755_v47 }
  0x46   : > { %1049 = vmatpush3.msra.mxu1 %v637_v33  ;;  %1083 = vmatpush3.msra.mxu0 %v755_v47 }
  0x47   : > { %1050 = vmatprep.subr.mxu1 %v636_v34  ;;  %1084 = vmatprep.subr.mxu0 %v754_v48 }
  0x48   : > { %1051 = vmatpush3.msra.mxu1 %v636_v34  ;;  %1085 = vmatpush3.msra.mxu0 %v754_v48 }
  0x49   : > { %1052 = vmatprep.subr.mxu1 %v635_v35  ;;  %1086 = vmatprep.subr.mxu0 %v753_v49 }
  0x4a   : > { %1053 = vmatpush3.msra.mxu1 %v635_v35  ;;  %1087 = vmatpush3.msra.mxu0 %v753_v49 }
  0x4b   : > { %1054 = vmatprep.subr.mxu1 %v634_v36  ;;  %1088 = vmatprep.subr.mxu0 %v752_v50 }
  0x4c   : > { %1055 = vmatpush3.msra.mxu1 %v634_v36  ;;  %1089 = vmatpush3.msra.mxu0 %v752_v50 }
  0x4d   : > { %1056 = vmatprep.subr.mxu1 %v633_v37  ;;  %1090 = vmatprep.subr.mxu0 %v751_v51 }
  0x4e   : > { %1057 = vmatpush3.msra.mxu1 %v633_v37  ;;  %1091 = vmatpush3.msra.mxu0 %v751_v51 }
  0x4f   : > { %1058 = vmatprep.subr.mxu1 %v632_v38  ;;  %1092 = vmatprep.subr.mxu0 %v750_v52 }
  0x50   : > { %1059 = vmatpush3.msra.mxu1 %v632_v38  ;;  %1093 = vmatpush3.msra.mxu0 %v750_v52 }
  0x51   : > { %1060 = vmatprep.subr.mxu1 %v631_v39  ;;  %1094 = vmatprep.subr.mxu0 %v749_v9 }
  0x52   : > { %1061 = vmatpush3.msra.mxu1 %v631_v39  ;;  %1095 = vmatpush3.msra.mxu0 %v749_v9 }
  0x53   : > { %1062 = vmatprep.subr.mxu1 %v630_v40  ;;  %1096 = vmatprep.subr.mxu0 %v748_v10 }
  0x54   : > { %1063 = vmatpush3.msra.mxu1 %v630_v40  ;;  %1097 = vmatpush3.msra.mxu0 %v748_v10 }
  0x55   : > { %1064 = vmatprep.subr.mxu1 %v629_v41  ;;  %1098 = vmatprep.subr.mxu0 %v747_v11 }
  0x56   : > { %1065 = vmatpush3.msra.mxu1 %v629_v41  ;;  %1099 = vmatpush3.msra.mxu0 %v747_v11 }
  0x57   : > { %1100 = vmatprep.subr.mxu0 %v746_v12 }
  0x58   : > { %1101 = vmatpush3.msra.mxu0 %v746_v12 }
  0x59   : > { %1102 = vmatprep.subr.mxu0 %v745_v13 }
  0x5a   : > { %1103 = vmatpush3.msra.mxu0 %v745_v13 }
  0xf0   : > { %v1010_v53 = vpop.f32.mrf.mxu0 }
  0xf2   : > { %v422_v54 = vpop.f32.mrf.mxu0 }
  0xf3   : > { %v1013_v55 = vpop.f32.mrf.mxu1 }
  0xf5   : > { %v432_v56 = vpop.f32.mrf.mxu1  ;;  %v1030_v57 = vpop.f32.mrf.mxu0 }
  0xf7   : > { %v1020_v58 = vpop.f32.mrf.mxu1  ;;  %v602_v59 = vpop.f32.mrf.mxu0 }
  0xf8   : > { %v622_v60 = vmul.f32 %v1020_v58, %v1010_v53 }
  0xf9   : > { %v512_v61 = vpop.f32.mrf.mxu1  ;;  %v1033_v0 = vpop.f32.mrf.mxu0 }
  0xfa   : > { %v621_v62 = vmul.f32 %v512_v61, %v422_v54  ;;  %v626_v2 = vmul.f32 %v1030_v57, %v622_v60 }
  0xfb   : > { %v1023_v63 = vpop.f32.mrf.mxu1  ;;  %v612_v6 = vpop.f32.mrf.mxu0 }
  0xfc   : > { %v625_v1 = vmul.f32 %v621_v62, %v602_v59  ;;  %v624_v3 = vmul.f32 %v1023_v63, %v1013_v55 }
  0xfd   : > { %v522_v4 = vpop.f32.mrf.mxu1 }
  0xfe   : > { %v623_v5 = vmul.f32 %v522_v4, %v432_v56  ;;  %1066 = vmatprep.mubr.f32.mxu1 %v625_v1  ;;  %v628_v8 = vmul.f32 %v1033_v0, %v624_v3 }
  0xff   : > { %1067 = vmatmul.mubr.f32.vlgmr.msra.gmra.mxu1 %v626_v2 }
 0x100   : > { %v627_v7 = vmul.f32 %v623_v5, %v612_v6 }
 0x102   : > { %1069 = vmatprep.mubr.f32.mxu1 %v627_v7 }
 0x103   : > { %1070 = vmatmul.mubr.f32.gmra.mxu1 %v628_v8 }
 0x1bf   : > { %v1068_v15 = vpop.f32.mrf.mxu1 }
 0x1c0   : > { %v724_v16 = vadd.f32 %v1068_v15, %v942_v14 }
 0x1c1   : > { %v718_v17 = vpop.f32.mrf.mxu1 }
 0x1c2   : > { %v719_v18 = vadd.f32 %v942_v14, %v718_v17  ;;  %v738_v19 = vmul.f32 0.25, %v724_v16 }
 0x1c3   : > { %v1071_v20 = vpop.f32.mrf.mxu1 }
 0x1c4   : > { %v737_v21 = vmul.f32 0.25, %v719_v18  ;;  %v734_v22 = vadd.f32 %v1071_v20, %v942_v14  ;;  %v742_v26 = vmax.f32 %v724_v16, %v738_v19 }
 0x1c5   : > { %v728_v23 = vpop.f32.mrf.mxu1 }
 0x1c6   : > { %v741_v24 = vmax.f32 %v719_v18, %v737_v21  ;;  %v729_v25 = vadd.f32 %v942_v14, %v728_v23  ;;  %v740_v27 = vmul.f32 0.25, %v734_v22 }
 0x1c8   : > { %v739_v28 = vmul.f32 0.25, %v729_v25  ;;  %1104 = vmatprep.mubr.f32.mxu0 %v741_v24  ;;  %v744_v30 = vmax.f32 %v734_v22, %v740_v27 }
 0x1c9   : > { %1105 = vmatmul.mubr.f32.vlgmr.msra.gmra.mxu0 %v742_v26 }
 0x1ca   : > { %v743_v29 = vmax.f32 %v729_v25, %v739_v28 }
 0x1cc   : > { %1107 = vmatprep.mubr.f32.mxu0 %v743_v29 }
 0x1cd   : > { %1108 = vmatmul.mubr.f32.gmra.mxu0 %v744_v30 }
 0x289   : > { %v1106_v31 = vpop.f32.mrf.mxu0 }
 0x28a   : > { %v840_v35 = vadd.f32 %v1106_v31, %v943_v32 }
 0x28b   : > { %v834_v33 = vpop.f32.mrf.mxu0 }
 0x28c   : > { %v835_v34 = vadd.f32 %v943_v32, %v834_v33  ;;  %855 = vst.msk [vmem:[%s307_s18 + $0x8] sm:$0xff] %vm853_vm2, %v840_v35 }
 0x28d   : > { %v1109_v36 = vpop.f32.mrf.mxu0 }
 0x28e   : > { %854 = vst.msk [vmem:[%s307_s18] sm:$0xff] %vm853_vm2, %v835_v34  ;;  %v850_v39 = vadd.f32 %v1109_v36, %v943_v32 }
 0x28f   : > { %v844_v37 = vpop.f32.mrf.mxu0 }
 0x290   : > { %v845_v38 = vadd.f32 %v943_v32, %v844_v37  ;;  %857 = vst.msk [vmem:[%s307_s18 + $0x18] sm:$0xff] %vm853_vm2, %v850_v39 }
 0x292   : > { %856 = vst.msk [vmem:[%s307_s18 + $0x10] sm:$0xff] %vm853_vm2, %v845_v38 }
 0x293 PF: > { %s18_s27 = sadd.s32 1, %s1144_s27  }
 0x294   : > { %p15_p4 = scmp.ge.s32.totalorder %s18_s27, 4  }
 0x296   :  { %17 = sbr.rel (!%p15_p4) target bundleno = 1 (0x1), region = 82 }

</bundles_post_ra>
